<compile_context>
chip_gen: v5e
topology: v5e:2x2
jax: 0.10.0
libtpu: 0.0.40
codegen_flags: <defaults>
</compile_context>

<pallas_src>
import jax
import jax.numpy as jnp
from jax.experimental import pallas as pl
from jax.experimental.pallas import tpu as pltpu

_LANE_W = 512                   # lane-dense last dim (multiple of 128)
_TILE_BYTES = 4 * 1024 * 1024   # per-buffer tile budget, sized by compute dtype


def _bf16_compute_ok() -> bool:
    """bf16 VPU/EUP exist on v6e and later; v5e and older must compute in f32."""
    try:
        kind = jax.devices()[0].device_kind.lower()
    except Exception:
        return False
    return ("v6" in kind) or ("v7" in kind)


def _vmem_limit_bytes() -> int:
    """Raised scoped-VMEM limit with a safety margin against physical capacity."""
    try:
        cap = int(pltpu.get_tpu_info().vmem_capacity_bytes)
        return min(48 << 20, (cap * 3) // 4)
    except Exception:
        return 32 << 20


def _make_gauss_kernel(mean: float, scale: float, compute_dtype):
    """scale = -1/(2*std^2) is baked in; per-element path is sub, mul, mul, exp."""
    def kernel(x_ref, o_ref):
        xm = x_ref[...].astype(compute_dtype) - mean
        o_ref[...] = jnp.exp(xm * xm * scale).astype(o_ref.dtype)
    return kernel


def gauss_pallas(x: jax.Array, mean: float, std: float) -> jax.Array:
    """Applies the Gauss membership function elementwise. Same shape/dtype as x."""
    orig_shape = x.shape
    orig_dtype = x.dtype
    n = x.size
    if n == 0:
        return x

    # NOTE: precomputing scale changes the degenerate std -> 0 edge case
    # (0 * -inf -> NaN instead of exp(0)); harmless for sane / learned std.
    mean = float(mean)
    scale = -1.0 / (2.0 * float(std) * float(std))

    itemsize = jnp.dtype(orig_dtype).itemsize
    compute_dtype = (
        jnp.bfloat16 if (orig_dtype == jnp.bfloat16 and _bf16_compute_ok()) else jnp.float32
    )
    compute_itemsize = jnp.dtype(compute_dtype).itemsize
    kernel = _make_gauss_kernel(mean, scale, compute_dtype)

    flat = x.reshape(-1)                       # contiguous -> free
    rows, rem = divmod(n, _LANE_W)
    sub_mult = max(8, 32 // itemsize)          # sublane packing: f32 8, bf16 16, int8 32

    # ---- tiny path: one whole-array block, no grid, no padding, no copies ----
    if rows < 2 * sub_mult:
        out = pl.pallas_call(
            kernel,
            out_shape=jax.ShapeDtypeStruct((1, n), orig_dtype),
        )(flat.reshape(1, n))
        return out.reshape(orig_shape)

    # ---- main path: lane-dense (rows, 512) slab, 1-D row grid ----
    aligned = rows * _LANE_W
    main = flat if rem == 0 else jax.lax.slice(flat, (0,), (aligned,))
    x2d = main.reshape(rows, _LANE_W)

    # Tile budget sized by the *compute* dtype so f32 intermediates stay bounded.
    budget_rows = _TILE_BYTES // (_LANE_W * max(itemsize, compute_itemsize))
    budget_rows = max(sub_mult, (budget_rows // sub_mult) * sub_mult)
    if rows <= budget_rows:
        # Split into >= 2 grid steps when possible so v7x's two TCs both get work.
        half = -(-rows // 2)
        tile_rows = -(-half // sub_mult) * sub_mult
    else:
        tile_rows = budget_rows
    tile_rows = max(sub_mult, min(tile_rows, budget_rows))
    grid = (pl.cdiv(rows, tile_rows),)         # last block may be partial (masked)

    cost = pl.CostEstimate(
        flops=3 * aligned,
        transcendentals=aligned,
        bytes_accessed=2 * aligned * itemsize,
    )

    out2d = pl.pallas_call(
        kernel,
        out_shape=jax.ShapeDtypeStruct((rows, _LANE_W), orig_dtype),
        grid=grid,
        in_specs=[pl.BlockSpec((tile_rows, _LANE_W), lambda i: (i, 0))],
        out_specs=pl.BlockSpec((tile_rows, _LANE_W), lambda i: (i, 0)),
        compiler_params=pltpu.CompilerParams(
            dimension_semantics=("parallel",),
            vmem_limit_bytes=_vmem_limit_bytes(),
        ),
        cost_estimate=cost,
    )(x2d)

    if rem == 0:
        return out2d.reshape(orig_shape)

    # <512-element ragged tail: trivial jnp epilogue (far cheaper than padding
    # and re-slicing the whole array around the kernel).
    tail = jax.lax.slice(flat, (aligned,), (n,)).astype(jnp.float32)
    tail_m = tail - mean
    out_tail = jnp.exp(tail_m * tail_m * scale).astype(orig_dtype)
    return jnp.concatenate([out2d.reshape(-1), out_tail]).reshape(orig_shape)


if __name__ == "__main__":
    # Deterministic parameter init (scalar nn.Parameters in the torch module).
    MEAN = 0.5
    STD = 1.25

    key = jax.random.PRNGKey(0)
    k1, k2, k3, k4, k5 = jax.random.split(key, 5)

    def ref_fn(x):
        xf = x.astype(jnp.float32)
        return jnp.exp(-((xf - MEAN) ** 2) / (2.0 * STD ** 2))

    # 1) ANFIS-like (batch, seq, features), f32 -> tiny whole-block path.
    x = jax.random.normal(k1, (2, 8, 32), dtype=jnp.float32)
    out = gauss_pallas(x, MEAN, STD)
    jax.block_until_ready(out)
    assert out.shape == x.shape and out.dtype == x.dtype
    assert jnp.allclose(out, ref_fn(x), atol=1e-5, rtol=1e-5), "f32 mismatch"

    # 2) Odd small shape (not a multiple of the lane width).
    x_odd = jax.random.normal(k2, (3, 7, 5), dtype=jnp.float32)
    out_odd = gauss_pallas(x_odd, MEAN, STD)
    jax.block_until_ready(out_odd)
    assert out_odd.shape == x_odd.shape
    assert jnp.allclose(out_odd, ref_fn(x_odd), atol=1e-5, rtol=1e-5), "odd mismatch"

    # 3) bf16 I/O (bf16-native compute on v6e/v7x, f32 compute on older chips).
    x_bf = jax.random.normal(k3, (2, 8, 32), dtype=jnp.bfloat16)
    out_bf = gauss_pallas(x_bf, MEAN, STD)
    jax.block_until_ready(out_bf)
    assert out_bf.dtype == jnp.bfloat16
    # ~4x bf16 eps tolerance: covers bf16-native sub/mul/exp on v6e/v7x.
    assert jnp.allclose(out_bf.astype(jnp.float32), ref_fn(x_bf), atol=3e-2), "bf16 mismatch"

    # 4) 512-aligned input -> tiled grid path (with a masked partial last block).
    x_big = jax.random.normal(k4, (4, 65, 128), dtype=jnp.float32)   # 65 rows of 512
    out_big = gauss_pallas(x_big, MEAN, STD)
    jax.block_until_ready(out_big)
    assert out_big.shape == x_big.shape
    assert jnp.allclose(out_big, ref_fn(x_big), atol=1e-5, rtol=1e-5), "tiled mismatch"

    # 5) Larger ragged input -> tiled prefix + jnp remainder epilogue.
    x_rag = jax.random.normal(k5, (9, 1000), dtype=jnp.float32)      # 17 rows + 296 tail
    out_rag = gauss_pallas(x_rag, MEAN, STD)
    jax.block_until_ready(out_rag)
    assert out_rag.shape == x_rag.shape
    assert jnp.allclose(out_rag, ref_fn(x_rag), atol=1e-5, rtol=1e-5), "ragged mismatch"

    print("KERNEL_OK")
</pallas_src>

<mosaic_0001>
module attributes {stable_mosaic.version = 11 : i64} {
  func.func @kernel(%arg0: memref<1x512xf32, #tpu.memory_space<vmem>>, %arg1: memref<1x512xf32, #tpu.memory_space<vmem>>) attributes {dimension_semantics = [], scalar_prefetch = 0 : i64, scratch_operands = 0 : i64, tpu.core_type = #tpu.core_type<tc>} {
    %c0 = arith.constant 0 : index
    %c0_0 = arith.constant 0 : index
    %0 = vector.load %arg0[%c0, %c0_0] : memref<1x512xf32, #tpu.memory_space<vmem>>, vector<1x512xf32>
    %cst = arith.constant 5.000000e-01 : f32
    %1 = vector.broadcast %cst : f32 to vector<1x512xf32>
    %2 = arith.subf %0, %1 : vector<1x512xf32>
    %3 = arith.mulf %2, %2 : vector<1x512xf32>
    %cst_1 = arith.constant -3.200000e-01 : f32
    %4 = vector.broadcast %cst_1 : f32 to vector<1x512xf32>
    %5 = arith.mulf %3, %4 : vector<1x512xf32>
    %6 = math.exp %5 : vector<1x512xf32>
    %c0_2 = arith.constant 0 : index
    %c0_3 = arith.constant 0 : index
    %7 = vector.load %arg1[%c0_2, %c0_3] : memref<1x512xf32, #tpu.memory_space<vmem>>, vector<1x512xf32>
    tpu.vector_store %arg1[%c0_2, %c0_3], %6 {strides = array<i32>} : memref<1x512xf32, #tpu.memory_space<vmem>>, vector<1x512xf32>,
    return
  }
}

</mosaic_0001>

<bundles_post_ra>
// kernel: tpu_custom_call.1
= control target key start
LH: loop header
LB: loop body
LE: loop exit
PB: predicated region body
PF: predicated region fallthrough
CT: control target
= control target key end

     0   :  { %6 = vsyncpa [#allocation3], 0  ;;  %s126_s0 = inlined_call_operand.hbm [shape: f32[1,512], index: 0, kind: input, shape index: {}]   ;;  %s127_s1 = inlined_call_operand.hbm [shape: f32[1,512], index: 1, kind: output, shape index: {}]  }
   0x1   :  { %7 = vsyncpa [#allocation4], 0  ;;  %s13_s8 = sshll.u32 %s126_s0, 4  ;;  %s108_s9 = smov [#allocation2]   ;;  %s14_s8 = int_to_ptr.hbm [resolvable:$true] %s13_s8 }
   0x2   :  { %s15_s10 = sshll.u32 %s108_s9, 4  ;;  %s16_s10 = int_to_ptr.vmem [resolvable:$true] %s15_s10 }
   0x3   :  { %18 = dma.hbm_to_vmem [thread:$0]  %s14_s8, 64, %s16_s10, [#allocation3]  }
   0x4   :  { %104 = dma.done.wait [#allocation3], 64  }
   0x5   :  { %105 = vsyncadd [#allocation3], 4294967232  ;;  %v23_v0 = vld [vmem:[#allocation2] sm:$0xf]  ;;  %v29_v5 = vlaneseq  ;;  %s109_s11 = smov [#allocation5]   ;;  %s41_s0 = sshll.u32 %s127_s1, 4  ;;  %s42_s0 = int_to_ptr.hbm [resolvable:$true] %s41_s0 }
   0x6   :  { %v51_v1 = vadd.f32 -0.5, %v23_v0  ;;  %s39_s12 = sshll.u32 %s109_s11, 4  ;;  %s40_s12 = int_to_ptr.vmem [resolvable:$true] %s39_s12 }
   0x7   :  { %vm31_vm0 = vcmp.lt.s32.totalorder %v29_v5, 512 }
   0x8   :  { %v25_v2 = vmul.f32 %v51_v1, %v51_v1 }
   0xa   :  { %v26_v3 = vmul.f32 -0.32, %v25_v2 }
   0xc   :  { %v27_v4 = vmul.f32 1.442695, %v26_v3 }
   0xe   :  { %54 = vpow2.f32 %v27_v4 }
  0x14   :  { %v55_v6 = vpop.eup %54 }
  0x15   :  { %33 = vst.msk [vmem:[#allocation5] sm:$0xf] %vm31_vm0, %v55_v6 }
  0x16   :  { %44 = dma.vmem_to_hbm [thread:$0]  %s40_s12, 64, %s42_s0, [#allocation4]  }
  0x17   :  { %106 = dma.done.wait [#allocation4], 64  }
  0x18   :  { %107 = vsyncadd [#allocation4], 4294967232 }
  0x19   :  { %49 = vsyncpa [#allocation3], 1 }
  0x1a   :  { %50 = vsyncpa [#allocation4], 1 }

</bundles_post_ra>
